<compile_context>
chip_gen: v7x
topology: tpu7x:2x2x1
jax: 0.10.0
libtpu: 0.0.40
codegen_flags: <defaults>
</compile_context>

<pallas_src>
import functools

import jax
import jax.numpy as jnp
from jax.experimental import pallas as pl
from jax.experimental.pallas import tpu as pltpu


# ---------------------------------------------------------------------------
# Glue: 1-D interpolation weight matrices (PyTorch semantics), built in JAX.
# ---------------------------------------------------------------------------
def _interp_matrix(in_size: int, out_size: int, mode: str) -> jnp.ndarray:
    """Returns W of shape (out_size, in_size) such that y = W @ x interpolates x."""
    if mode == "nearest":
        # PyTorch legacy 'nearest': src = floor(dst * in / out)
        idx = jnp.floor(
            jnp.arange(out_size, dtype=jnp.float32) * (in_size / out_size)
        ).astype(jnp.int32)
        idx = jnp.clip(idx, 0, in_size - 1)
        return jax.nn.one_hot(idx, in_size, dtype=jnp.float32)
    elif mode == "bilinear":
        # PyTorch 'bilinear', align_corners=False (the default):
        # src = (dst + 0.5) * (in/out) - 0.5, clamped; blend of floor/ceil rows.
        scale = in_size / out_size
        src = (jnp.arange(out_size, dtype=jnp.float32) + 0.5) * scale - 0.5
        src = jnp.clip(src, 0.0, float(in_size - 1))
        i0 = jnp.floor(src).astype(jnp.int32)
        i1 = jnp.minimum(i0 + 1, in_size - 1)
        frac = src - i0.astype(jnp.float32)
        return (
            jax.nn.one_hot(i0, in_size, dtype=jnp.float32) * (1.0 - frac)[:, None]
            + jax.nn.one_hot(i1, in_size, dtype=jnp.float32) * frac[:, None]
        )
    else:
        raise ValueError(f"unsupported mode: {mode}")


# ---------------------------------------------------------------------------
# Pallas kernel: one grid step handles BB (n, c) slices with two big matmuls.
# ---------------------------------------------------------------------------
def _interp_kernel(x_ref, wht_ref, ww_ref, o_ref):
    bb, h_in, w_in = x_ref.shape
    h_out = wht_ref.shape[1]
    w_out = ww_ref.shape[1]

    x = x_ref[...]                                          # (BB, H_in, W_in)

    # H interpolation: fold (BB, W_in) into the MXU M dimension.
    xs = jnp.swapaxes(x, 1, 2).reshape(bb * w_in, h_in)     # (BB*W_in, H_in)
    u = jnp.dot(xs, wht_ref[...],
                preferred_element_type=jnp.float32)         # (BB*W_in, H_out)
    u = u.astype(x.dtype)                                   # keep MXU operands narrow

    # W interpolation: fold (BB, H_out) into the MXU M dimension.
    us = jnp.swapaxes(u.reshape(bb, w_in, h_out), 1, 2)     # (BB, H_out, W_in)
    z = jnp.dot(us.reshape(bb * h_out, w_in), ww_ref[...],
                preferred_element_type=jnp.float32)         # (BB*H_out, W_out)

    o_ref[...] = z.reshape(bb, h_out, w_out).astype(o_ref.dtype)


def _pick_batch_block(b, h_in, w_in, h_out, w_out, itemsize):
    """Largest batch block whose double-buffered working set fits a safe VMEM budget."""
    per_slice = 2 * (h_in * w_in + h_out * w_out) * itemsize          # in/out blocks, 2-deep pipeline
    per_slice += 4 * (2 * h_in * w_in + 2 * w_in * h_out
                      + 2 * h_out * w_in + h_out * w_out)             # f32 intermediates / swaps
    budget = 10 * 1024 * 1024     # conservative: leaves headroom on v7x (64 MiB physical VMEM)
    bb = max(1, min(b, budget // max(per_slice, 1)))
    bb = min(bb, 256)             # keep several grid steps for large B (v7x 2-TC sharding)
    if bb >= 8:
        bb = (bb // 8) * 8        # sublane-friendly folds
    return bb


@functools.partial(jax.jit, static_argnames=("output_size", "mode"))
def interpolate_layer(x: jnp.ndarray, output_size, mode: str = "bilinear"):
    """Equivalent of InterpolateLayer(output_size, mode)(x) for NCHW input."""
    if isinstance(output_size, int):
        output_size = (output_size, output_size)
    n, c, h_in, w_in = x.shape
    h_out, w_out = output_size

    # Compute dtype: keep low-precision floats on the fast MXU pipe, f32 otherwise.
    if x.dtype in (jnp.bfloat16, jnp.float16):
        compute_dtype = x.dtype
    else:
        compute_dtype = jnp.float32

    wht = _interp_matrix(h_in, h_out, mode).T.astype(compute_dtype)   # (H_in, H_out)
    ww = _interp_matrix(w_in, w_out, mode).T.astype(compute_dtype)    # (W_in, W_out)

    b = n * c
    itemsize = jnp.dtype(compute_dtype).itemsize
    bb = _pick_batch_block(b, h_in, w_in, h_out, w_out, itemsize)
    num_blocks = (b + bb - 1) // bb
    b_pad = num_blocks * bb

    x_flat = x.reshape(b, h_in, w_in).astype(compute_dtype)
    if b_pad != b:
        x_flat = jnp.pad(x_flat, ((0, b_pad - b), (0, 0), (0, 0)))

    out_flat = pl.pallas_call(
        _interp_kernel,
        out_shape=jax.ShapeDtypeStruct((b_pad, h_out, w_out), x.dtype),
        grid_spec=pltpu.PrefetchScalarGridSpec(
            num_scalar_prefetch=0,
            grid=(num_blocks,),
            in_specs=[
                pl.BlockSpec((bb, h_in, w_in), lambda i: (i, 0, 0)),
                pl.BlockSpec((h_in, h_out), lambda i: (0, 0)),   # weights stay resident
                pl.BlockSpec((w_in, w_out), lambda i: (0, 0)),   # weights stay resident
            ],
            out_specs=pl.BlockSpec((bb, h_out, w_out), lambda i: (i, 0, 0)),
        ),
        compiler_params=pltpu.CompilerParams(
            dimension_semantics=("parallel",),
            vmem_limit_bytes=32 * 1024 * 1024,
        ),
    )(x_flat, wht, ww)

    return out_flat[:b].reshape(n, c, h_out, w_out)


if __name__ == "__main__":
    key = jax.random.PRNGKey(0)
    # NCHW input, small shapes
    x = jax.random.normal(key, (2, 4, 16, 16), dtype=jnp.float32)

    # bilinear upsample 16x16 -> 32x32
    out = interpolate_layer(x, (32, 32), "bilinear")
    jax.block_until_ready(out)
    wh = _interp_matrix(16, 32, "bilinear")
    ww = _interp_matrix(16, 32, "bilinear")
    ref = jnp.einsum("oh,nchw,pw->ncop", wh, x, ww)
    assert out.shape == (2, 4, 32, 32)
    assert jnp.allclose(out, ref, atol=1e-5, rtol=1e-5)

    # nearest resize 16x16 -> (8, 24)
    out_n = interpolate_layer(x, (8, 24), "nearest")
    jax.block_until_ready(out_n)
    idx_h = jnp.floor(jnp.arange(8) * (16 / 8)).astype(jnp.int32)
    idx_w = jnp.floor(jnp.arange(24) * (16 / 24)).astype(jnp.int32)
    ref_n = x[:, :, idx_h, :][:, :, :, idx_w]
    assert out_n.shape == (2, 4, 8, 24)
    assert jnp.allclose(out_n, ref_n, atol=1e-6, rtol=1e-6)

    # bf16 path: operands stay bf16 on the MXU (looser tolerance)
    out_bf = interpolate_layer(x.astype(jnp.bfloat16), (32, 32), "bilinear")
    jax.block_until_ready(out_bf)
    assert out_bf.dtype == jnp.bfloat16
    assert jnp.allclose(out_bf.astype(jnp.float32), ref, atol=1e-1, rtol=1e-1)

    print("KERNEL_OK")
</pallas_src>

<mosaic_0001>
module attributes {stable_mosaic.version = 11 : i64} {
  func.func @_interp_kernel(%arg0: i32, %arg1: memref<8x16x16xf32, #tpu.memory_space<vmem>>, %arg2: memref<16x32xf32, #tpu.memory_space<vmem>>, %arg3: memref<16x32xf32, #tpu.memory_space<vmem>>, %arg4: memref<8x32x32xf32, #tpu.memory_space<vmem>>) attributes {dimension_semantics = [#tpu.dimension_semantics<parallel>], iteration_bounds = array<i64: 1>, scalar_prefetch = 0 : i64, scratch_operands = 0 : i64, tpu.core_type = #tpu.core_type<tc>, window_params = [{transform_indices = @transform_0, window_bounds = array<i64: 8, 16, 16>}, {pipeline_mode = #tpu.pipeline_mode<synchronous>, transform_indices = @transform_1, window_bounds = array<i64: 16, 32>}, {pipeline_mode = #tpu.pipeline_mode<synchronous>, transform_indices = @transform_2, window_bounds = array<i64: 16, 32>}, {transform_indices = @transform_3, window_bounds = array<i64: 8, 32, 32>}]} {
    %c0 = arith.constant 0 : index
    %c0_0 = arith.constant 0 : index
    %c0_1 = arith.constant 0 : index
    %0 = vector.load %arg1[%c0, %c0_0, %c0_1] : memref<8x16x16xf32, #tpu.memory_space<vmem>>, vector<8x16x16xf32>
    %1 = tpu.transpose %0, [0, 2, 1] : vector<8x16x16xf32> -> vector<8x16x16xf32>
    %2 = vector.shape_cast %1 : vector<8x16x16xf32> to vector<128x16xf32>
    %c0_2 = arith.constant 0 : index
    %c0_3 = arith.constant 0 : index
    %3 = vector.load %arg2[%c0_2, %c0_3] : memref<16x32xf32, #tpu.memory_space<vmem>>, vector<16x32xf32>
    %cst = arith.constant dense<0.000000e+00> : vector<128x32xf32>
    %4 = tpu.matmul %2, %3, %cst {dimension_numbers = #tpu.dot_dimension_numbers<[1], [0], [0], [1], [0, 0, 1, 1], [], []>} : vector<128x16xf32>, vector<16x32xf32>, vector<128x32xf32> -> vector<128x32xf32>
    %5 = vector.shape_cast %4 : vector<128x32xf32> to vector<8x16x32xf32>
    %6 = tpu.transpose %5, [0, 2, 1] : vector<8x16x32xf32> -> vector<8x32x16xf32>
    %7 = vector.shape_cast %6 : vector<8x32x16xf32> to vector<256x16xf32>
    %c0_4 = arith.constant 0 : index
    %c0_5 = arith.constant 0 : index
    %8 = vector.load %arg3[%c0_4, %c0_5] : memref<16x32xf32, #tpu.memory_space<vmem>>, vector<16x32xf32>
    %cst_6 = arith.constant dense<0.000000e+00> : vector<256x32xf32>
    %9 = tpu.matmul %7, %8, %cst_6 {dimension_numbers = #tpu.dot_dimension_numbers<[1], [0], [0], [1], [0, 0, 1, 1], [], []>} : vector<256x16xf32>, vector<16x32xf32>, vector<256x32xf32> -> vector<256x32xf32>
    %10 = vector.shape_cast %9 : vector<256x32xf32> to vector<8x32x32xf32>
    %c0_7 = arith.constant 0 : index
    %c0_8 = arith.constant 0 : index
    %c0_9 = arith.constant 0 : index
    %11 = vector.load %arg4[%c0_7, %c0_8, %c0_9] : memref<8x32x32xf32, #tpu.memory_space<vmem>>, vector<8x32x32xf32>
    tpu.vector_store %arg4[%c0_7, %c0_8, %c0_9], %10 {strides = array<i32>} : memref<8x32x32xf32, #tpu.memory_space<vmem>>, vector<8x32x32xf32>,
    return
  }
  func.func @transform_0(%arg0: i32) -> (i32, i32, i32) {
    %c0_i32 = arith.constant 0 : i32
    %c0_i32_0 = arith.constant 0 : i32
    %c0_i32_1 = arith.constant 0 : i32
    return %arg0, %c0_i32, %c0_i32_0 : i32, i32, i32
  }
  func.func @transform_1(%arg0: i32) -> (i32, i32) {
    %c0_i32 = arith.constant 0 : i32
    %c0_i32_0 = arith.constant 0 : i32
    %c0_i32_1 = arith.constant 0 : i32
    return %c0_i32, %c0_i32_0 : i32, i32
  }
  func.func @transform_2(%arg0: i32) -> (i32, i32) {
    %c0_i32 = arith.constant 0 : i32
    %c0_i32_0 = arith.constant 0 : i32
    %c0_i32_1 = arith.constant 0 : i32
    return %c0_i32, %c0_i32_0 : i32, i32
  }
  func.func @transform_3(%arg0: i32) -> (i32, i32, i32) {
    %c0_i32 = arith.constant 0 : i32
    %c0_i32_0 = arith.constant 0 : i32
    %c0_i32_1 = arith.constant 0 : i32
    return %arg0, %c0_i32, %c0_i32_0 : i32, i32, i32
  }
}

</mosaic_0001>

<bundles_post_ra>
// kernel: interpolate_layer.1
= control target key start
LH: loop header
LB: loop body
LE: loop exit
PB: predicated region body
PF: predicated region fallthrough
CT: control target
= control target key end

     0   :  { %8 = vsyncpa [#allocation3], 0  ;;  %s1515_s0 = inlined_call_operand.hbm [shape: f32[8,16,16], index: 0, kind: input, shape index: {}]   ;;  %s1516_s1 = inlined_call_operand.vmem [shape: f32[16,32], index: 1, kind: input, shape index: {}, may-alias: {1,2}]   ;;  %s1517_s2 = inlined_call_operand.vmem [shape: f32[16,32], index: 2, kind: input, shape index: {}, may-alias: {1,2}]   ;;  %s1518_s3 = inlined_call_operand.hbm [shape: f32[8,32,32], index: 3, kind: output, shape index: {}]  }
   0x1   :  { %9 = vsyncpa [#allocation4], 0  ;;  %s1369_s12 = smov [#allocation2]   ;;  %s1321_s16 = scalar_lea.hbm %s1515_s0, 2048 }
   0x2   :  { %s15_s13 = sshll.u32 %s1369_s12, 4  ;;  %p1322_p0 = scmp.ne.s32.totalorder %s1515_s0, %s1321_s16  ;;  %s16_s13 = int_to_ptr.vmem [resolvable:$true] %s15_s13 }
   0x3   :  { %p1325_p1 = scmp.lt.u32.totalorder %s1321_s16, %s1515_s0 }
   0x5   :  { %p1327_p2 = pnand %p1325_p1, %p1322_p0 }
   0x7   :  { %1330 = shalt.err (!%p1327_p2)
}
   0x8   :  { %s1331_s21 = scalar_lea.vmem %s16_s13, 2048  ;;  %p1336_p4 = scmp.lt.s32.totalorder %s16_s13, %s16_s13 }
   0x9   :  { %p1332_p3 = scmp.ne.s32.totalorder %s16_s13, %s1331_s21  ;;  %p1337_p5 = scmp.lt.s32.totalorder %s1331_s21, %s1331_s21 }
   0xb   :  { %p1338_p6 = por %p1337_p5, %p1336_p4 }
   0xd   :  { %p1339_p7 = pnand %p1338_p6, %p1332_p3 }
   0xf   :  { %1342 = shalt.err (!%p1339_p7)
}
  0x10   :  { %s1370_s22 = smov 128   ;;  %s1371_s23 = smov 8  }
  0x11   :  { %21 = dma.hbm_to_vmem [thread:$0]  %s1515_s0, 2048, %s16_s13, [#allocation3], %s1370_s22, %s1370_s22, %s1371_s23  }
  0x12   :  { %1365 = dma.done.wait [#allocation3], 2048  }
  0x13   :  { %1366 = vsyncadd [#allocation3], 4294965248  ;;  %v29_v0 = vld [vmem:[#allocation2] sm:$0xff]  ;;  %v31_v1 = vld [vmem:[#allocation2 + $0x10] sm:$0xff]  ;;  %vm303_vm0 = vcmask 130048   ;;  %vm1076_vm1 = vcmask 261120  }
  0x14   :  { %45 = vxpose.xlu0.b32.start [1/2] (short) (narrow) %v29_v0, 16  ;;  %77 = vxpose.xlu1.b32.start [1/2] (short) (narrow) %v31_v1, 16  ;;  %v30_v2 = vld [vmem:[#allocation2 + $0x8] sm:$0xff]  ;;  %v32_v3 = vld [vmem:[#allocation2 + $0x18] sm:$0xff]  ;;  %v301_v4 = vld [vmem:[%s1516_s1] sm:$0xff] }
  0x15   :  { %v302_v5 = vld [vmem:[%s1516_s1 + $0x8] sm:$0xff]  ;;  %v33_v6 = vld [vmem:[#allocation2 + $0x20] sm:$0xff]  ;;  %v35_v7 = vld [vmem:[#allocation2 + $0x30] sm:$0xff] }
  0x16   :  { %v1306_v8 = vpack.c.bf16 %v302_v5, %v301_v4  ;;  %v34_v9 = vld [vmem:[#allocation2 + $0x28] sm:$0xff]  ;;  %v36_v10 = vld [vmem:[#allocation2 + $0x38] sm:$0xff]  ;;  %v37_v11 = vld [vmem:[#allocation2 + $0x40] sm:$0xff] }
  0x17   :  { %v39_v12 = vld [vmem:[#allocation2 + $0x50] sm:$0xff]  ;;  %v38_v13 = vld [vmem:[#allocation2 + $0x48] sm:$0xff]  ;;  %v40_v14 = vld [vmem:[#allocation2 + $0x58] sm:$0xff] }
  0x18   :  { %46 = vxpose.xlu0.b32.end [2/2] (short) (narrow) %v30_v2, 16  ;;  %78 = vxpose.xlu1.b32.end [2/2] (short) (narrow) %v32_v3, 16  ;;  %v41_v15 = vld [vmem:[#allocation2 + $0x60] sm:$0xff]  ;;  %v43_v16 = vld [vmem:[#allocation2 + $0x70] sm:$0xff]  ;;  %v42_v17 = vld [vmem:[#allocation2 + $0x68] sm:$0xff] }
  0x19   :  { %1307 = vmatprep.subr.bf16.mxu0 %v1306_v8  ;;  %v44_v18 = vld [vmem:[#allocation2 + $0x78] sm:$0xff]  ;;  %v753_v41 = vld [vmem:[%s1517_s2] sm:$0xff]  ;;  %v754_v42 = vld [vmem:[%s1517_s2 + $0x8] sm:$0xff]  ;;  %s1372_s2 = smov [#allocation5]  }
  0x1a   :  { %1309 = vmatpush3.bf16.msra.mxu0 %v1306_v8  ;;  %v1310_v43 = vpack.c.bf16 %v754_v42, %v753_v41  ;;  %s1114_s5 = sshll.u32 %s1372_s2, 4  ;;  %s1115_s5 = int_to_ptr.vmem [resolvable:$true] %s1114_s5 }
  0x1b   :  { %s1343_s6 = scalar_lea.vmem %s1115_s5, 4096  ;;  %p1348_p9 = scmp.lt.s32.totalorder %s1115_s5, %s1115_s5 }
  0x1c   :  { %109 = vxpose.xlu0.b32.start [1/2] (short) (narrow) %v33_v6, 16  ;;  %141 = vxpose.xlu1.b32.start [1/2] (short) (narrow) %v35_v7, 16  ;;  %p1344_p8 = scmp.ne.s32.totalorder %s1115_s5, %s1343_s6  ;;  %p1349_p10 = scmp.lt.s32.totalorder %s1343_s6, %s1343_s6 }
  0x1d   :  { %1314 = vmatprep.subr.bf16.mxu1 %v1310_v43  ;;  %1311 = vmatprep.subr.bf16.mxu0 %v1310_v43 }
  0x1e   :  { %1315 = vmatpush3.bf16.msra.mxu1 %v1310_v43  ;;  %p1350_p11 = por %p1349_p10, %p1348_p9 }
  0x20   :  { %110 = vxpose.xlu0.b32.end [2/2] (short) (narrow) %v34_v9, 16  ;;  %142 = vxpose.xlu1.b32.end [2/2] (short) (narrow) %v36_v10, 16  ;;  %p1351_p12 = pnand %p1350_p11, %p1344_p8 }
  0x24   :  { %173 = vxpose.xlu0.b32.start [1/2] (short) (narrow) %v37_v11, 16  ;;  %205 = vxpose.xlu1.b32.start [1/2] (short) (narrow) %v39_v12, 16 }
  0x28   :  { %174 = vxpose.xlu0.b32.end [2/2] (short) (narrow) %v38_v13, 16  ;;  %206 = vxpose.xlu1.b32.end [2/2] (short) (narrow) %v40_v14, 16 }
  0x2c   :  { %237 = vxpose.xlu0.b32.start [1/2] (short) (narrow) %v41_v15, 16  ;;  %269 = vxpose.xlu1.b32.start [1/2] (short) (narrow) %v43_v16, 16 }
  0x30   :  { %238 = vxpose.xlu0.b32.end [2/2] (short) (narrow) %v42_v17, 16  ;;  %270 = vxpose.xlu1.b32.end [2/2] (short) (narrow) %v44_v18, 16 }
  0x94   :  { %v61_v19 = vpop.trf.xlu0  ;;  %v93_v20 = vpop.trf.xlu1 }
  0x95   :  { %1230 = vmatprep.mubr.msk.f32.mxu0 %vm303_vm0, %v61_v19 }
  0x98   :  { %v62_v21 = vpop.trf.xlu0  ;;  %v94_v22 = vpop.trf.xlu1 }
  0x99   :  { %1231 = vmatmul.mubr.msk.f32.vlgmr.msra.gmra.mrb[0].mxu0 %vm303_vm0, %v62_v21 }
  0x9a   :  { %1233 = vmatprep.mubr.msk.f32.mxu0 %vm303_vm0, %v93_v20  ;;  %1313 = vmatpush3.bf16.msra.mxu0 %v1310_v43 }
  0x9c   :  { %v125_v23 = vpop.trf.xlu0  ;;  %v157_v24 = vpop.trf.xlu1 }
  0x9d   :  { %1234 = vmatmul.mubr.msk.f32.gmra.mrb[2].mxu0 %vm303_vm0, %v94_v22 }
  0x9e   :  { %1236 = vmatprep.mubr.msk.f32.mxu0 %vm303_vm0, %v125_v23 }
  0xa0   :  { %v126_v25 = vpop.trf.xlu0  ;;  %v158_v26 = vpop.trf.xlu1 }
  0xa1   :  { %1237 = vmatmul.mubr.msk.f32.gmra.mrb[4].mxu0 %vm303_vm0, %v126_v25 }
  0xa2   :  { %1239 = vmatprep.mubr.msk.f32.mxu0 %vm303_vm0, %v157_v24 }
  0xa4   :  { %v189_v27 = vpop.trf.xlu0  ;;  %v221_v28 = vpop.trf.xlu1 }
  0xa5   :  { %1240 = vmatmul.mubr.msk.f32.gmra.mrb[6].mxu0 %vm303_vm0, %v158_v26 }
  0xa6   :  { %1242 = vmatprep.mubr.msk.f32.mxu0 %vm303_vm0, %v189_v27 }
  0xa8   :  { %v190_v29 = vpop.trf.xlu0  ;;  %v222_v30 = vpop.trf.xlu1 }
  0xa9   :  { %1243 = vmatmul.mubr.msk.f32.gmra.mrb[8].mxu0 %vm303_vm0, %v190_v29 }
  0xaa   :  { %1245 = vmatprep.mubr.msk.f32.mxu0 %vm303_vm0, %v221_v28 }
  0xac   :  { %v253_v31 = vpop.trf.xlu0  ;;  %v285_v32 = vpop.trf.xlu1 }
  0xad   :  { %1246 = vmatmul.mubr.msk.f32.gmra.mrb[10].mxu0 %vm303_vm0, %v222_v30 }
  0xae   :  { %1248 = vmatprep.mubr.msk.f32.mxu0 %vm303_vm0, %v253_v31 }
  0xb0   :  { %v254_v33 = vpop.trf.xlu0  ;;  %v286_v34 = vpop.trf.xlu1 }
  0xb1   :  { %1249 = vmatmul.mubr.msk.f32.gmra.mrb[12].mxu0 %vm303_vm0, %v254_v33 }
  0xb2   :  { %1251 = vmatprep.mubr.msk.f32.mxu0 %vm303_vm0, %v285_v32 }
  0xb5   :  { %1252 = vmatmul.mubr.msk.f32.gmra.mrb[14].mxu0 %vm303_vm0, %v286_v34 }
 0x16c   :  { %v1232_v35 = vpop.f32.mrb[0].mxu0 }
 0x16d   :  { %v418_v36 = vpop.f32.mrb[1].mxu0 }
 0x170   :  { %v1235_v37 = vpop.f32.mrb[2].mxu0 }
 0x171   :  { %v428_v38 = vpop.f32.mrb[3].mxu0 }
 0x174   :  { %v1238_v39 = vpop.f32.mrb[4].mxu0 }
 0x175   :  { %v438_v40 = vpop.f32.mrb[5].mxu0 }
 0x176   :  { %561 = vxpose.xlu0.b32.start [1/2] (short) (narrow) %v438_v40, 32 }
 0x178   :  { %v1241_v44 = vpop.f32.mrb[6].mxu0 }
 0x179   :  { %v448_v45 = vpop.f32.mrb[7].mxu0 }
 0x17a   :  { %562 = vxpose.xlu0.b32.end [2/2] (short) (narrow) %v1238_v39, 32  ;;  %593 = vxpose.xlu1.b32.start [1/2] (short) (narrow) %v448_v45, 32 }
 0x17c   :  { %v1244_v46 = vpop.f32.mrb[8].mxu0 }
 0x17d   :  { %v458_v47 = vpop.f32.mrb[9].mxu0 }
 0x17e   :  { %594 = vxpose.xlu1.b32.end [2/2] (short) (narrow) %v1241_v44, 32 }
 0x180   :  { %v1247_v48 = vpop.f32.mrb[10].mxu0 }
 0x181   :  { %v468_v49 = vpop.f32.mrb[11].mxu0 }
 0x183   :  { %625 = vxpose.xlu0.b32.start [1/2] (short) (narrow) %v458_v47, 32 }
 0x184   :  { %v1250_v50 = vpop.f32.mrb[12].mxu0 }
 0x185   :  { %v478_v51 = vpop.f32.mrb[13].mxu0 }
 0x187   :  { %626 = vxpose.xlu0.b32.end [2/2] (short) (narrow) %v1244_v46, 32  ;;  %657 = vxpose.xlu1.b32.start [1/2] (short) (narrow) %v468_v49, 32 }
 0x188   :  { %v1253_v52 = vpop.f32.mrb[14].mxu0 }
 0x189   :  { %v488_v53 = vpop.f32.mrb[15].mxu0 }
 0x18b   :  { %658 = vxpose.xlu1.b32.end [2/2] (short) (narrow) %v1247_v48, 32 }
 0x190   :  { %497 = vxpose.xlu0.b32.start [1/2] (short) (narrow) %v418_v36, 32 }
 0x194   :  { %498 = vxpose.xlu0.b32.end [2/2] (short) (narrow) %v1232_v35, 32  ;;  %689 = vxpose.xlu1.b32.start [1/2] (short) (narrow) %v478_v51, 32 }
 0x198   :  { %690 = vxpose.xlu1.b32.end [2/2] (short) (narrow) %v1250_v50, 32 }
 0x19d   :  { %529 = vxpose.xlu0.b32.start [1/2] (short) (narrow) %v428_v38, 32 }
 0x1a1   :  { %530 = vxpose.xlu0.b32.end [2/2] (short) (narrow) %v1235_v37, 32  ;;  %721 = vxpose.xlu1.b32.start [1/2] (short) (narrow) %v488_v53, 32 }
 0x1a5   :  { %722 = vxpose.xlu1.b32.end [2/2] (short) (narrow) %v1253_v52, 32 }
 0x1f6   :  { %v577_v54 = vpop.trf.xlu0 }
 0x1f7   :  { %1270 = vmatprep.mubr.msk.f32.mxu1 %vm303_vm0, %v577_v54 }
 0x1fa   :  { %v609_v55 = vpop.trf.xlu1  ;;  %v578_v56 = vpop.trf.xlu0 }
 0x1fb   :  { %1271 = vmatmul.mubr.msk.f32.vlgmr.msra.gmra.mrb[0].mxu1 %vm303_vm0, %v578_v56 }
 0x1fe   :  { %v610_v57 = vpop.trf.xlu1  ;;  %v579_v58 = vpop.trf.xlu0 }
 0x1ff   :  { %1273 = vmatprep.mubr.msk.f32.mxu1 %vm303_vm0, %v579_v58 }
 0x202   :  { %v611_v59 = vpop.trf.xlu1  ;;  %v580_v60 = vpop.trf.xlu0 }
 0x203   :  { %1274 = vmatmul.mubr.msk.f32.gmra.mrb[2].mxu1 %vm303_vm0, %v580_v60 }
 0x204   :  { %1276 = vmatprep.mubr.msk.f32.mxu1 %vm303_vm0, %v609_v55 }
 0x206   :  { %v612_v61 = vpop.trf.xlu1  ;;  %v641_v62 = vpop.trf.xlu0 }
 0x207   :  { %1277 = vmatmul.mubr.msk.f32.gmra.mrb[4].mxu1 %vm303_vm0, %v610_v57 }
 0x208   :  { %1279 = vmatprep.mubr.msk.f32.mxu1 %vm303_vm0, %v611_v59 }
 0x20a   :  { %v673_v63 = vpop.trf.xlu1  ;;  %v642_v0 = vpop.trf.xlu0 }
 0x20b   :  { %1280 = vmatmul.mubr.msk.f32.gmra.mrb[6].mxu1 %vm303_vm0, %v612_v61 }
 0x20c   :  { %1282 = vmatprep.mubr.msk.f32.mxu1 %vm303_vm0, %v641_v62 }
 0x20e   :  { %v674_v1 = vpop.trf.xlu1  ;;  %v643_v2 = vpop.trf.xlu0 }
 0x20f   :  { %1283 = vmatmul.mubr.msk.f32.gmra.mrb[8].mxu1 %vm303_vm0, %v642_v0 }
 0x210   :  { %1285 = vmatprep.mubr.msk.f32.mxu1 %vm303_vm0, %v643_v2 }
 0x212   :  { %v675_v3 = vpop.trf.xlu1  ;;  %v644_v4 = vpop.trf.xlu0 }
 0x213   :  { %1286 = vmatmul.mubr.msk.f32.gmra.mrb[10].mxu1 %vm303_vm0, %v644_v4 }
 0x214   :  { %1288 = vmatprep.mubr.msk.f32.mxu1 %vm303_vm0, %v673_v63 }
 0x216   :  { %v676_v5 = vpop.trf.xlu1  ;;  %v513_v6 = vpop.trf.xlu0 }
 0x217   :  { %1289 = vmatmul.mubr.msk.f32.gmra.mrb[12].mxu1 %vm303_vm0, %v674_v1  ;;  %1258 = vmatprep.mubr.msk.f32.mxu0 %vm303_vm0, %v513_v6 }
 0x218   :  { %1291 = vmatprep.mubr.msk.f32.mxu1 %vm303_vm0, %v675_v3 }
 0x21a   :  { %v705_v7 = vpop.trf.xlu1  ;;  %v514_v8 = vpop.trf.xlu0 }
 0x21b   :  { %1292 = vmatmul.mubr.msk.f32.gmra.mrb[14].mxu1 %vm303_vm0, %v676_v5  ;;  %1259 = vmatmul.mubr.msk.f32.vlgmr.msra.gmra.mrb[16].mxu0 %vm303_vm0, %v514_v8 }
 0x21c   :  { %1294 = vmatprep.mubr.msk.f32.mxu1 %vm303_vm0, %v705_v7 }
 0x21e   :  { %v706_v9 = vpop.trf.xlu1  ;;  %v515_v10 = vpop.trf.xlu0 }
 0x21f   :  { %1295 = vmatmul.mubr.msk.f32.gmra.mrb[16].mxu1 %vm303_vm0, %v706_v9  ;;  %1261 = vmatprep.mubr.msk.f32.mxu0 %vm303_vm0, %v515_v10 }
 0x222   :  { %v707_v11 = vpop.trf.xlu1  ;;  %v516_v12 = vpop.trf.xlu0 }
 0x223   :  { %1297 = vmatprep.mubr.msk.f32.mxu1 %vm303_vm0, %v707_v11  ;;  %1262 = vmatmul.mubr.msk.f32.gmra.mrb[18].mxu0 %vm303_vm0, %v516_v12 }
 0x226   :  { %v708_v13 = vpop.trf.xlu1  ;;  %v545_v14 = vpop.trf.xlu0 }
 0x227   :  { %1298 = vmatmul.mubr.msk.f32.gmra.mrb[18].mxu1 %vm303_vm0, %v708_v13  ;;  %1264 = vmatprep.mubr.msk.f32.mxu0 %vm303_vm0, %v545_v14 }
 0x22a   :  { %v737_v15 = vpop.trf.xlu1  ;;  %v546_v16 = vpop.trf.xlu0 }
 0x22b   :  { %1300 = vmatprep.mubr.msk.f32.mxu1 %vm303_vm0, %v737_v15  ;;  %1265 = vmatmul.mubr.msk.f32.gmra.mrb[20].mxu0 %vm303_vm0, %v546_v16 }
 0x22e   :  { %v738_v17 = vpop.trf.xlu1  ;;  %v547_v18 = vpop.trf.xlu0 }
 0x22f   :  { %1301 = vmatmul.mubr.msk.f32.gmra.mrb[20].mxu1 %vm303_vm0, %v738_v17  ;;  %1267 = vmatprep.mubr.msk.f32.mxu0 %vm303_vm0, %v547_v18 }
 0x232   :  { %v739_v19 = vpop.trf.xlu1  ;;  %v548_v20 = vpop.trf.xlu0 }
 0x233   :  { %1303 = vmatprep.mubr.msk.f32.mxu1 %vm303_vm0, %v739_v19  ;;  %1268 = vmatmul.mubr.msk.f32.gmra.mrb[22].mxu0 %vm303_vm0, %v548_v20 }
 0x236   :  { %v740_v21 = vpop.trf.xlu1 }
 0x237   :  { %1304 = vmatmul.mubr.msk.f32.gmra.mrb[22].mxu1 %vm303_vm0, %v740_v21 }
 0x2ce   :  { %v1272_v22 = vpop.f32.mrb[0].mxu1 }
 0x2cf   :  { %1086 = vst.msk [vmem:[#allocation5 + $0x48] sm:$0xff] %vm1076_vm1, %v1272_v22  ;;  %v957_v23 = vpop.f32.mrb[1].mxu1 }
 0x2d0   :  { %1085 = vst.msk [vmem:[#allocation5 + $0x40] sm:$0xff] %vm1076_vm1, %v957_v23 }
 0x2d6   :  { %v1275_v24 = vpop.f32.mrb[2].mxu1 }
 0x2d7   :  { %1088 = vst.msk [vmem:[#allocation5 + $0x58] sm:$0xff] %vm1076_vm1, %v1275_v24  ;;  %v967_v25 = vpop.f32.mrb[3].mxu1 }
 0x2d8   :  { %1087 = vst.msk [vmem:[#allocation5 + $0x50] sm:$0xff] %vm1076_vm1, %v967_v25 }
 0x2da   :  { %v1278_v26 = vpop.f32.mrb[4].mxu1 }
 0x2db   :  { %1090 = vst.msk [vmem:[#allocation5 + $0x68] sm:$0xff] %vm1076_vm1, %v1278_v26  ;;  %v977_v27 = vpop.f32.mrb[5].mxu1 }
 0x2dc   :  { %1089 = vst.msk [vmem:[#allocation5 + $0x60] sm:$0xff] %vm1076_vm1, %v977_v27 }
 0x2de   :  { %v1281_v28 = vpop.f32.mrb[6].mxu1 }
 0x2df   :  { %1092 = vst.msk [vmem:[#allocation5 + $0x78] sm:$0xff] %vm1076_vm1, %v1281_v28  ;;  %v987_v29 = vpop.f32.mrb[7].mxu1 }
 0x2e0   :  { %1091 = vst.msk [vmem:[#allocation5 + $0x70] sm:$0xff] %vm1076_vm1, %v987_v29 }
 0x2e2   :  { %v1284_v30 = vpop.f32.mrb[8].mxu1 }
 0x2e3   :  { %1094 = vst.msk [vmem:[#allocation5 + $0x88] sm:$0xff] %vm1076_vm1, %v1284_v30  ;;  %v997_v31 = vpop.f32.mrb[9].mxu1 }
 0x2e4   :  { %1093 = vst.msk [vmem:[#allocation5 + $0x80] sm:$0xff] %vm1076_vm1, %v997_v31 }
 0x2e6   :  { %v1287_v32 = vpop.f32.mrb[10].mxu1 }
 0x2e7   :  { %1096 = vst.msk [vmem:[#allocation5 + $0x98] sm:$0xff] %vm1076_vm1, %v1287_v32  ;;  %v1007_v33 = vpop.f32.mrb[11].mxu1 }
 0x2e8   :  { %1095 = vst.msk [vmem:[#allocation5 + $0x90] sm:$0xff] %vm1076_vm1, %v1007_v33 }
 0x2ea   :  { %v1290_v34 = vpop.f32.mrb[12].mxu1 }
 0x2eb   :  { %1098 = vst.msk [vmem:[#allocation5 + $0xa8] sm:$0xff] %vm1076_vm1, %v1290_v34  ;;  %v1017_v35 = vpop.f32.mrb[13].mxu1 }
 0x2ec   :  { %1097 = vst.msk [vmem:[#allocation5 + $0xa0] sm:$0xff] %vm1076_vm1, %v1017_v35 }
 0x2ee   :  { %v1293_v36 = vpop.f32.mrb[14].mxu1  ;;  %v1260_v37 = vpop.f32.mrb[16].mxu0 }
 0x2ef   :  { %1100 = vst.msk [vmem:[#allocation5 + $0xb8] sm:$0xff] %vm1076_vm1, %v1293_v36  ;;  %v1027_v38 = vpop.f32.mrb[15].mxu1  ;;  %1078 = vst.msk [vmem:[#allocation5 + $0x8] sm:$0xff] %vm1076_vm1, %v1260_v37  ;;  %v917_v39 = vpop.f32.mrb[17].mxu0 }
 0x2f0   :  { %1099 = vst.msk [vmem:[#allocation5 + $0xb0] sm:$0xff] %vm1076_vm1, %v1027_v38  ;;  %1077 = vst.msk [vmem:[#allocation5] sm:$0xff] %vm1076_vm1, %v917_v39 }
 0x2f2   :  { %v1296_v40 = vpop.f32.mrb[16].mxu1 }
 0x2f3   :  { %1102 = vst.msk [vmem:[#allocation5 + $0xc8] sm:$0xff] %vm1076_vm1, %v1296_v40  ;;  %v1037_v41 = vpop.f32.mrb[17].mxu1 }
 0x2f4   :  { %1101 = vst.msk [vmem:[#allocation5 + $0xc0] sm:$0xff] %vm1076_vm1, %v1037_v41 }
 0x2f6   :  { %v1263_v42 = vpop.f32.mrb[18].mxu0 }
 0x2f7   :  { %1080 = vst.msk [vmem:[#allocation5 + $0x18] sm:$0xff] %vm1076_vm1, %v1263_v42  ;;  %v927_v43 = vpop.f32.mrb[19].mxu0 }
 0x2f8   :  { %1079 = vst.msk [vmem:[#allocation5 + $0x10] sm:$0xff] %vm1076_vm1, %v927_v43 }
 0x2fa   :  { %v1299_v44 = vpop.f32.mrb[18].mxu1 }
 0x2fb   :  { %1104 = vst.msk [vmem:[#allocation5 + $0xd8] sm:$0xff] %vm1076_vm1, %v1299_v44  ;;  %v1047_v45 = vpop.f32.mrb[19].mxu1 }
 0x2fc   :  { %1103 = vst.msk [vmem:[#allocation5 + $0xd0] sm:$0xff] %vm1076_vm1, %v1047_v45 }
 0x2fe   :  { %v1266_v46 = vpop.f32.mrb[20].mxu0 }
 0x2ff   :  { %1082 = vst.msk [vmem:[#allocation5 + $0x28] sm:$0xff] %vm1076_vm1, %v1266_v46  ;;  %v937_v47 = vpop.f32.mrb[21].mxu0 }
 0x300   :  { %1081 = vst.msk [vmem:[#allocation5 + $0x20] sm:$0xff] %vm1076_vm1, %v937_v47 }
 0x302   :  { %v1302_v48 = vpop.f32.mrb[20].mxu1 }
 0x303   :  { %1106 = vst.msk [vmem:[#allocation5 + $0xe8] sm:$0xff] %vm1076_vm1, %v1302_v48  ;;  %v1057_v49 = vpop.f32.mrb[21].mxu1 }
 0x304   :  { %1105 = vst.msk [vmem:[#allocation5 + $0xe0] sm:$0xff] %vm1076_vm1, %v1057_v49 }
 0x306   :  { %v1269_v50 = vpop.f32.mrb[22].mxu0 }
 0x307   :  { %1084 = vst.msk [vmem:[#allocation5 + $0x38] sm:$0xff] %vm1076_vm1, %v1269_v50  ;;  %v947_v51 = vpop.f32.mrb[23].mxu0 }
 0x308   :  { %1083 = vst.msk [vmem:[#allocation5 + $0x30] sm:$0xff] %vm1076_vm1, %v947_v51 }
 0x30a   :  { %v1305_v52 = vpop.f32.mrb[22].mxu1 }
 0x30b   :  { %1108 = vst.msk [vmem:[#allocation5 + $0xf8] sm:$0xff] %vm1076_vm1, %v1305_v52  ;;  %v1067_v53 = vpop.f32.mrb[23].mxu1 }
 0x30c   :  { %1107 = vst.msk [vmem:[#allocation5 + $0xf0] sm:$0xff] %vm1076_vm1, %v1067_v53 }
 0x30d   :  { %1354 = shalt.err (!%p1351_p12)
}
 0x30e   :  { %s1355_s9 = scalar_lea.hbm %s1518_s3, 4096 }
 0x30f   :  { %p1356_p13 = scmp.ne.s32.totalorder %s1518_s3, %s1355_s9  ;;  %p1359_p0 = scmp.lt.u32.totalorder %s1355_s9, %s1518_s3 }
 0x311   :  { %p1361_p1 = pnand %p1359_p0, %p1356_p13 }
 0x313   :  { %1364 = shalt.err (!%p1361_p1)
}
 0x314   :  { %1120 = dma.vmem_to_hbm [thread:$0]  %s1115_s5, 4096, %s1518_s3, [#allocation4], %s1370_s22, %s1370_s22, %s1371_s23  }
 0x315   :  { %1367 = dma.done.wait [#allocation4], 4096  }
 0x316   :  { %1368 = vsyncadd [#allocation4], 4294963200 }
 0x317   :  { %1124 = vsyncpa [#allocation3], 1 }
 0x318   :  { %1125 = vsyncpa [#allocation4], 1 }

</bundles_post_ra>
